<compile_context>
chip_gen: v6e
topology: v6e:2x2x1
jax: 0.10.0
libtpu: 0.0.40
codegen_flags: <defaults>
</compile_context>

<pallas_src>
import jax
import jax.numpy as jnp
from jax.experimental import pallas as pl
from jax.experimental.pallas import tpu as pltpu

LANE = 128              # TPU lane width (last dim)
MIN_GRID_STEPS = 8      # keep >= ~8 grid steps so the pipeline overlaps and
                        # v7x can shard the stream across both TensorCores


def _chip_tile_config():
    """Per-generation (target_tile_bytes, vmem_limit_bytes_or_None)."""
    try:
        kind = jax.devices()[0].device_kind.lower()
    except Exception:  # pragma: no cover - e.g. no devices yet
        kind = ""
    if "v7" in kind or "7x" in kind:
        # 3.2 TB/s HBM per TC: big tiles amortize the ~0.35us per-step cost.
        # 2x(8 MiB in + 8 MiB out) = 32 MiB -> raise scoped VMEM for headroom.
        return 8 * 1024 * 1024, 48 * 1024 * 1024
    if "v6" in kind:
        # 2x(4+4) = 16 MiB fits comfortably under v6e's 32 MiB scoped default.
        return 4 * 1024 * 1024, None
    # v5e (16 MiB scoped VMEM default) and unknown chips: 2 MiB tiles,
    # 2x(2+2) = 8 MiB double-buffered; already hides per-step overhead there.
    return 2 * 1024 * 1024, None


def swish_kernel(sp_ref, x_ref, o_ref):
    # sp_ref: SMEM scalar = softplus(beta), precomputed in the wrapper.
    sp = sp_ref[0]
    x = x_ref[...].astype(jnp.float32)          # upcast in-register only
    z = x * sp
    sig = 1.0 / (1.0 + jnp.exp(-z))             # exp on EUP; kernel is HBM-bound
    o_ref[...] = ((x * sig) * (1.0 / 1.1)).astype(o_ref.dtype)


def _swish_plain(x, sp_scalar):
    """Plain-JAX fallback for the <128-element ragged tail / tiny inputs."""
    xf = x.astype(jnp.float32)
    return ((xf * jax.nn.sigmoid(xf * sp_scalar)) * (1.0 / 1.1)).astype(x.dtype)


def swish_fn(x, beta):
    """x: any shape/dtype array. beta: scalar or shape-(1,) parameter (init 0.5)."""
    orig_shape = x.shape
    orig_dtype = x.dtype

    # Normalize beta (handles 0-d scalars) and precompute stable softplus once.
    beta1 = jnp.atleast_1d(jnp.asarray(beta, jnp.float32)).reshape(-1)[:1]
    sp = jax.nn.softplus(beta1)                 # shape (1,), lives in SMEM

    flat = x.reshape(-1)
    n = flat.shape[0]
    main = (n // LANE) * LANE                   # 128-aligned prefix length

    if main == 0:
        # Entire array is smaller than one lane row: not worth a kernel launch.
        return _swish_plain(flat, sp[0]).reshape(orig_shape)

    x2d = (flat if main == n else flat[:main]).reshape(-1, LANE)
    M = x2d.shape[0]

    itemsize = jnp.dtype(orig_dtype).itemsize
    sub = max(8, 32 // itemsize)                # min sublane tile: 8 f32 / 16 bf16 / 32 i8

    tile_bytes, vmem_limit = _chip_tile_config()
    rows_cap = max(sub, tile_bytes // (LANE * itemsize))   # VMEM-driven cap
    rows_for_steps = pl.cdiv(M, MIN_GRID_STEPS)            # pipelining-driven cap
    tm = min(rows_cap, rows_for_steps)
    tm = max(sub, (tm // sub) * sub)            # dtype-aware sublane alignment
    if tm >= M:
        tm = M                                  # tiny input: one full block (always legal)
    grid = (pl.cdiv(M, tm),)                    # ragged last row-block handled by Pallas

    cp_kwargs = dict(dimension_semantics=("parallel",))    # megacore-shardable on v7x
    if vmem_limit is not None:
        cp_kwargs["vmem_limit_bytes"] = vmem_limit

    out2d = pl.pallas_call(
        swish_kernel,
        out_shape=jax.ShapeDtypeStruct((M, LANE), orig_dtype),
        grid=grid,
        in_specs=[
            pl.BlockSpec(memory_space=pltpu.SMEM),          # softplus(beta) scalar
            pl.BlockSpec((tm, LANE), lambda i: (i, 0)),     # input tile (native dtype)
        ],
        out_specs=pl.BlockSpec((tm, LANE), lambda i: (i, 0)),
        compiler_params=pltpu.CompilerParams(**cp_kwargs),
    )(sp, x2d)

    out_main = out2d.reshape(-1)
    if main != n:
        # <128-element ragged tail: tiny separate op, no full-array pad/slice.
        out = jnp.concatenate([out_main, _swish_plain(flat[main:], sp[0])])
    else:
        out = out_main
    return out.reshape(orig_shape)


def _reference(x, beta):
    sp = jax.nn.softplus(jnp.atleast_1d(jnp.asarray(beta, jnp.float32)))[0]
    xf = x.astype(jnp.float32)
    return (xf * jax.nn.sigmoid(xf * sp)) / 1.1


if __name__ == "__main__":
    key = jax.random.PRNGKey(0)
    beta = jnp.array([0.5], dtype=jnp.float32)   # matches SwishFn.__init__

    # 1) Small NCHW f32 input (like the PyTorch module would see).
    x = jax.random.normal(key, (2, 4, 16, 16), dtype=jnp.float32)
    out = jax.block_until_ready(swish_fn(x, beta))
    assert out.shape == x.shape and out.dtype == x.dtype
    assert jnp.allclose(out, _reference(x, beta), atol=1e-5, rtol=1e-5)

    # 2) Larger f32 input that exercises the multi-step (pipelined) grid path.
    k2 = jax.random.PRNGKey(1)
    x_big = jax.random.normal(k2, (8, 16, 64, 64), dtype=jnp.float32)
    out_big = jax.block_until_ready(swish_fn(x_big, beta))
    assert jnp.allclose(out_big, _reference(x_big, beta), atol=1e-5, rtol=1e-5)

    # 3) bf16 input: native-dtype DMA, f32 compute in-register, bf16 store.
    x_bf16 = x.astype(jnp.bfloat16)
    out_bf16 = jax.block_until_ready(swish_fn(x_bf16, beta))
    assert out_bf16.dtype == jnp.bfloat16
    assert jnp.allclose(out_bf16.astype(jnp.float32), _reference(x_bf16, beta),
                        atol=5e-2, rtol=5e-2)

    # 4) Non-128-aligned element count (exercises the pad-free ragged-tail path).
    x_odd = jax.random.normal(jax.random.PRNGKey(2), (3, 7, 13), dtype=jnp.float32)
    out_odd = jax.block_until_ready(swish_fn(x_odd, beta))
    assert out_odd.shape == x_odd.shape
    assert jnp.allclose(out_odd, _reference(x_odd, beta), atol=1e-5, rtol=1e-5)

    # 5) 0-d beta (normalized inside the wrapper).
    out_scalar_beta = jax.block_until_ready(swish_fn(x, jnp.float32(0.5)))
    assert jnp.allclose(out_scalar_beta, _reference(x, beta), atol=1e-5, rtol=1e-5)

    print("KERNEL_OK")
</pallas_src>

<mosaic_0001>
module attributes {stable_mosaic.version = 11 : i64} {
  func.func @swish_kernel(%arg0: i32, %arg1: memref<1xf32, #tpu.memory_space<smem>>, %arg2: memref<8x128xf32, #tpu.memory_space<vmem>>, %arg3: memref<8x128xf32, #tpu.memory_space<vmem>>) attributes {dimension_semantics = [#tpu.dimension_semantics<parallel>], iteration_bounds = array<i64: 2>, scalar_prefetch = 0 : i64, scratch_operands = 0 : i64, tpu.core_type = #tpu.core_type<tc>, window_params = [{transform_indices = @transform_0, window_bounds = array<i64: 1>}, {transform_indices = @transform_1, window_bounds = array<i64: 8, 128>}, {transform_indices = @transform_2, window_bounds = array<i64: 8, 128>}]} {
    %c0 = arith.constant 0 : index
    %0 = memref.load %arg1[%c0] : memref<1xf32, #tpu.memory_space<smem>>
    %c0_0 = arith.constant 0 : index
    %c0_1 = arith.constant 0 : index
    %1 = vector.load %arg2[%c0_0, %c0_1] : memref<8x128xf32, #tpu.memory_space<vmem>>, vector<8x128xf32>
    %2 = vector.broadcast %0 : f32 to vector<8x128xf32>
    %3 = arith.mulf %1, %2 : vector<8x128xf32>
    %cst = arith.constant 0.000000e+00 : f32
    %4 = vector.broadcast %cst : f32 to vector<8x128xf32>
    %5 = arith.subf %4, %3 : vector<8x128xf32>
    %6 = math.exp %5 : vector<8x128xf32>
    %cst_2 = arith.constant 1.000000e+00 : f32
    %7 = vector.broadcast %cst_2 : f32 to vector<8x128xf32>
    %8 = arith.addf %7, %6 : vector<8x128xf32>
    %cst_3 = arith.constant 1.000000e+00 : f32
    %9 = vector.broadcast %cst_3 : f32 to vector<8x128xf32>
    %10 = arith.divf %9, %8 : vector<8x128xf32>
    %11 = arith.mulf %1, %10 : vector<8x128xf32>
    %cst_4 = arith.constant 0.909090936 : f32
    %12 = vector.broadcast %cst_4 : f32 to vector<8x128xf32>
    %13 = arith.mulf %11, %12 : vector<8x128xf32>
    %c0_5 = arith.constant 0 : index
    %c0_6 = arith.constant 0 : index
    %14 = vector.load %arg3[%c0_5, %c0_6] : memref<8x128xf32, #tpu.memory_space<vmem>>, vector<8x128xf32>
    tpu.vector_store %arg3[%c0_5, %c0_6], %13 {strides = array<i32>} : memref<8x128xf32, #tpu.memory_space<vmem>>, vector<8x128xf32>,
    return
  }
  func.func @transform_0(%arg0: i32) -> i32 {
    %c0_i32 = arith.constant 0 : i32
    %c0_i32_0 = arith.constant 0 : i32
    return %c0_i32 : i32
  }
  func.func @transform_1(%arg0: i32) -> (i32, i32) {
    %c0_i32 = arith.constant 0 : i32
    %c0_i32_0 = arith.constant 0 : i32
    return %arg0, %c0_i32 : i32, i32
  }
  func.func @transform_2(%arg0: i32) -> (i32, i32) {
    %c0_i32 = arith.constant 0 : i32
    %c0_i32_0 = arith.constant 0 : i32
    return %arg0, %c0_i32 : i32, i32
  }
}

</mosaic_0001>

<bundles_post_ra>
// kernel: tpu_custom_call.1
= control target key start
LH: loop header
LB: loop body
LE: loop exit
PB: predicated region body
PF: predicated region fallthrough
CT: control target
= control target key end

     0   :  { %s574_s0 = inlined_call_operand.<no memory space> [shape: f32[1], index: 0, kind: input, shape index: {}]   ;;  %s575_s1 = inlined_call_operand.hbm [shape: f32[16,128], index: 1, kind: input, shape index: {}]   ;;  %s576_s2 = inlined_call_operand.hbm [shape: f32[16,128], index: 2, kind: output, shape index: {}]  }
   0x1   :  { %7 = sst [smem:[#allocation2]] %s574_s0 }
   0x2   :  { %8 = vsyncpa [#allocation4], 0 }
   0x3   :  { %10 = vsyncpa [#allocation4 + $0x1], 0 }
   0x4   :  { %11 = vsyncpa [#allocation5], 0 }
   0x5   :  { %13 = vsyncpa [#allocation5 + $0x1], 0  ;;  %s433_s11 = smov 0   ;;  %s435_s12 = smov 0  }
   0x6   :  { %s437_s13 = smov 0   ;;  %s439_s14 = smov 0  }
   0x7 LB: > { %s454_s0 = sadd.s32 4294967295, %s411_s14   ;;  %s257_s15 = sadd.s32 4294967294, %s411_s14   ;;  %s411_s14 = sphi %s439_s14, %s593_s14   ;;  %s407_s13 = sphi %s437_s13, %s592_s13   ;;  %s403_s12 = sphi %s435_s12, %s591_s12   ;;  %s399_s11 = sphi %s433_s11, %s590_s11  }
   0x8   : > { %s458_s16 = sadd.s32 1, %s411_s14   ;;  %s47_s17 = sadd.s32 1, %s407_s13 }
   0x9   : > { %s44_s18 = ssub.s32 %s411_s14, %s458_s16  ;;  %p54_p0 = scmp.ne.s32.totalorder %s407_s13, %s403_s12 }
   0xa   : > { %p45_p1 = scmp.eq.s32.totalorder %s44_s18, 0  ;;  %p55_p2 = scmp.eq.s32.totalorder %s411_s14, 0 }
   0xb   : > { %p60_p3 = scmp.ne.s32.totalorder %s403_s12, %s399_s11  ;;  %p61_p4 = scmp.eq.s32.totalorder %s454_s0, 0 }
   0xc   : > { %s470_s19 = scalar_select %p45_p1, %s407_s13, %s47_s17  }
   0xd   : > { %p472_p5 = por %p55_p2, %p54_p0  ;;  %p476_p6 = por %p61_p4, %p60_p3 }
   0xe   : > { %p84_p7 = scmp.eq.s32.totalorder %s454_s0, 1  ;;  %p90_p8 = scmp.eq.s32.totalorder %s257_s15, 1 }
   0xf   : > { %s580_s21 = scalar_select %p476_p6, 1, 0 }
  0x10   : > { %p281_p10 = scmp.lt.s32.totalorder %s411_s14, 2  ;;  %p483_p11 = por %p84_p7, %p54_p0 }
  0x11   : > { %p487_p12 = por %p90_p8, %p60_p3  ;;  %s113_s24 = sand.u32 1, %s407_s13  }
  0x12   : > { %s581_s22 = scalar_select %p483_p11, 1, 0 }
  0x13   : > { %s582_s23 = scalar_select %p487_p12, 1, 0 }
  0x14   : > { %s261_s25 = sshll.u32 %s411_s14, 7  ;;  %s260_s26 = sshll.u32 %s113_s24, 3 }
  0x15   : > { %s496_s29 = scalar_lea.hbm %s575_s1, %s261_s25  ;;  %s117_s30 = scalar_lea.vmem [#allocation3], %s260_s26 }
  0x16   : > { %s124_s3 = sshll.u32 %s117_s30, 4  ;;  %p500_p13 = pnand %p281_p10, %p472_p5  ;;  %s504_s3 = int_to_ptr.vmem [resolvable:$true] %s124_s3 }
  0x17   : > { %s114_s5 = scalar_lea.sflag [#allocation4], %s113_s24  ;;  %s319_s6 = scalar_lea.hbm %s496_s29, 128 }
  0x18   : > { %p320_p2 = scmp.ne.s32.totalorder %s496_s29, %s319_s6  ;;  %p321_p3 = pneg %p500_p13 }
  0x19   : > { %s324_s9 = scalar_lea.hbm %s575_s1, 256  ;;  %p325_p5 = scmp.lt.s32.totalorder %s496_s29, %s575_s1 }
  0x1a   : > { %p322_p4 = pnand %p321_p3, %p320_p2  ;;  %p326_p8 = scmp.lt.s32.totalorder %s324_s9, %s319_s6 }
  0x1c   : > { %p323_p7 = pneg %p322_p4  ;;  %p327_p10 = por %p326_p8, %p325_p5 }
  0x1e   : > { %p328_p9 = pnand %p327_p10, %p323_p7 }
  0x20   : > { %331 = shalt.err (!%p328_p9)
}
  0x21   : > { %s332_s17 = scalar_lea.vmem %s504_s3, 128  ;;  %s413_s18 = smov [#allocation3]  }
  0x22   : > { %p333_p0 = scmp.ne.s32.totalorder %s504_s3, %s332_s17  ;;  %s337_s20 = sshll.u32 %s413_s18, 4  ;;  %s338_s20 = int_to_ptr.vmem [resolvable:$false] %s337_s20 }
  0x23   : > { %s339_s24 = scalar_lea.vmem %s338_s20, 256  ;;  %p340_p4 = scmp.lt.s32.totalorder %s504_s3, %s338_s20 }
  0x24   : > { %p335_p1 = pnand %p333_p0, %p321_p3  ;;  %p341_p12 = scmp.lt.s32.totalorder %s339_s24, %s332_s17 }
  0x26   : > { %p336_p2 = pneg %p335_p1  ;;  %p342_p11 = por %p341_p12, %p340_p4 }
  0x28   : > { %p343_p6 = pnand %p342_p11, %p336_p2 }
  0x2a   : > { %346 = shalt.err (!%p343_p6)
}
  0x2b   : > { %276 = dma.hbm_to_vmem [thread:$0]  (!%p500_p13), %s496_s29, 128, %s504_s3, %s114_s5  }
  0x2c   : > { %p584_p9 = scmp.lt.s32.totalorder %s411_s14, 3  ;;  %p585_p7 = scmp.ge.s32.totalorder %s411_s14, 1 }
  0x2e   : > { %p130_p0 = pnand %p585_p7, %p584_p9 }
  0x2f   : > { %s531_s25 = sand.u32 (!%p130_p0), 1, %s403_s12   ;;  %p586_p6 = scmp.ne.s32.totalorder (!%p130_p0), %s580_s21, 0 }
  0x30   : > { %133 = sbr.rel (%p130_p0) target bundleno = 114 (0x72), region = 28  ;;  %s263_s26 = sshll.u32 (!%p130_p0), %s531_s25, 3 }
  0x31   : > { %s136_s27 = scalar_lea.sflag (!%p130_p0), [#allocation4], %s531_s25  ;;  %s139_s28 = scalar_lea.vmem (!%p130_p0), [#allocation3], %s263_s26 }
  0x35   : > { %390 = dma.done.wait (%p586_p6), %s136_s27, 128  }
  0x36   : > { %392 = vsyncadd (%p586_p6), %s136_s27, 4294967168  ;;  %s160_s29 = sld [smem:[#allocation2]]  ;;  %v161_v1 = vld [vmem:[%s139_s28] sm:$0xff]  ;;  %s159_s30 = scalar_lea.vmem [#allocation6], %s263_s26 }
  0x37   : > { %s187_s3 = sshll.u32 %s159_s30, 4  ;;  %s266_s4 = sshll.u32 %s454_s0, 7  ;;  %s188_s3 = int_to_ptr.vmem [resolvable:$true] %s187_s3 }
  0x38   : > { %s185_s6 = scalar_lea.hbm %s576_s2, %s266_s4  ;;  %s174_s7 = scalar_lea.sflag [#allocation5], %s531_s25 }
  0x39   : > { %s347_s8 = scalar_lea.vmem %s188_s3, 128  ;;  %p587_p12 = scmp.ne.s32.totalorder %s581_s22, 0 }
  0x3a   : > { %p348_p11 = scmp.ne.s32.totalorder %s188_s3, %s347_s8  ;;  %s414_s9 = smov [#allocation6]  }
  0x3b   : > { %s351_s10 = sshll.u32 %s414_s9, 4  ;;  %s352_s10 = int_to_ptr.vmem [resolvable:$false] %s351_s10 }
  0x3c   : > { %v162_v0 = vstv %s160_s29  ;;  %p349_p13 = pnand %p348_p11, %p587_p12  ;;  %s353_s15 = scalar_lea.vmem %s352_s10, 256 }
  0x3d   : > { %v163_v2 = vmul.f32 %v162_v0, %v161_v1  ;;  %p354_p3 = scmp.lt.s32.totalorder %s188_s3, %s352_s10  ;;  %p355_p5 = scmp.lt.s32.totalorder %s353_s15, %s347_s8 }
  0x3e   : > { %p350_p1 = pneg %p349_p13 }
  0x3f   : > { %v164_v3 = vsub.f32 0.0, %v163_v2  ;;  %p356_p8 = por %p355_p5, %p354_p3 }
  0x41   : > { %v165_v4 = vmul.f32 1.442695, %v164_v3  ;;  %p357_p10 = pnand %p356_p8, %p350_p1 }
  0x43   : > { %315 = vpow2.f32 %v165_v4 }
  0x50   : > { %v316_v5 = vpop.eup %315 }
  0x51   : > { %v167_v6 = vadd.f32 1.0, %v316_v5 }
  0x53   : > { %317 = vrcp.f32 %v167_v6 }
  0x60   : > { %v318_v7 = vpop.eup %317 }
  0x61   : > { %v170_v8 = vmul.f32 %v318_v7, %v161_v1 }
  0x63   : > { %v171_v9 = vmul.f32 0.90909094, %v170_v8 }
  0x65   : > { %172 = vst [vmem:[%s159_s30] sm:$0xff] %v171_v9 }
  0x66   : > { %360 = shalt.err (!%p357_p10)
}
  0x67   : > { %s361_s0 = scalar_lea.hbm %s185_s6, 128  ;;  %s365_s20 = scalar_lea.hbm %s576_s2, 256 }
  0x68   : > { %p362_p2 = scmp.ne.s32.totalorder %s185_s6, %s361_s0  ;;  %p366_p7 = scmp.lt.s32.totalorder %s185_s6, %s576_s2 }
  0x69   : > { %p367_p0 = scmp.lt.s32.totalorder %s365_s20, %s361_s0 }
  0x6a   : > { %p363_p4 = pnand %p362_p2, %p587_p12 }
  0x6b   : > { %p368_p6 = por %p367_p0, %p366_p7 }
  0x6c   : > { %p364_p9 = pneg %p363_p4 }
  0x6e   : > { %p369_p11 = pnand %p368_p6, %p364_p9 }
  0x70   : > { %372 = shalt.err (!%p369_p11)
}
  0x71   : > { %271 = dma.vmem_to_hbm [thread:$0]  (%p587_p12), %s188_s3, 128, %s185_s6, %s174_s7  }
  0x72 PF: > { %s199_s26 = sand.u32 1, %s399_s11   ;;  %p588_p13 = scmp.ne.s32.totalorder %s582_s23, 0 }
  0x73   : > { %p589_p1 = scmp.ge.s32.totalorder %s411_s14, 2  ;;  %s200_s27 = scalar_lea.sflag [#allocation5], %s199_s26 }
  0x75   : > { %p278_p3 = pnand %p589_p1, %p588_p13 }
  0x77   : > { %p279_p5 = pneg %p278_p3 }
  0x79   : > { %394 = dma.done.wait (%p279_p5), %s200_s27, 128  }
  0x7a   : > { %396 = vsyncadd (%p279_p5), %s200_s27, 4294967168  ;;  %p16_p8 = scmp.ge.s32.totalorder %s458_s16, 4   ;;  %s590_s11 = smov %s403_s12 }
  0x7b   : > { %s591_s12 = smov %s407_s13  ;;  %s592_s13 = smov %s470_s19 }
  0x7c   : > { %s593_s14 = smov %s458_s16  ;;  %18 = sbr.rel (!%p16_p8) target bundleno = 7 (0x7), region = 73 }
  0x81   :  { %205 = vsyncpa [#allocation4], 1 }
  0x82   :  { %207 = vsyncpa [#allocation4 + $0x1], 1 }
  0x83   :  { %208 = vsyncpa [#allocation5], 1 }
  0x84   :  { %210 = vsyncpa [#allocation5 + $0x1], 1 }

</bundles_post_ra>
